<compile_context>
chip_gen: v7x
topology: tpu7x:2x2x1
jax: 0.10.0
libtpu: 0.0.40
codegen_flags: <defaults>
</compile_context>

<pallas_src>
import math
import numpy as np
import jax
import jax.numpy as jnp
from jax.experimental import pallas as pl
from jax.experimental.pallas import tpu as pltpu


# ---------------------------------------------------------------------------
# Shape-only operator matrices (host-side glue).
# ---------------------------------------------------------------------------
def adaptive_pool_matrix(out_size: int, in_size: int) -> np.ndarray:
    """P[i, h] s.t. (P @ v) == adaptive_avg_pool1d(v, out_size) (PyTorch rule)."""
    P = np.zeros((out_size, in_size), np.float32)
    for i in range(out_size):
        s = (i * in_size) // out_size
        e = math.ceil((i + 1) * in_size / out_size)
        P[i, s:e] = 1.0 / (e - s)
    return P


def bilinear_matrix(out_size: int, in_size: int) -> np.ndarray:
    """U[y, i] for 1-D linear interpolation with align_corners=True."""
    U = np.zeros((out_size, in_size), np.float32)
    for y in range(out_size):
        if in_size == 1:
            U[y, 0] = 1.0
            continue
        src = y * (in_size - 1) / (out_size - 1) if out_size > 1 else 0.0
        lo = min(int(math.floor(src)), in_size - 2)
        f = src - lo
        U[y, lo] += 1.0 - f
        U[y, lo + 1] += f
    return U


def _round_up(v: int, m: int) -> int:
    return ((v + m - 1) // m) * m


def _build_constants(pyramids, H, W, compute_dtype):
    """Fused K_all^T (HW, BBp) and per-level full-width U_l^T (BBp, HW)."""
    HW = H * W
    bbs = [b * b for b in pyramids]
    offs = [0]
    for bb in bbs:
        offs.append(offs[-1] + bb)
    BBp = _round_up(max(offs[-1], 1), 128)          # pad total bins to 128 lanes

    KT = np.zeros((HW, BBp), np.float32)
    uts = []
    for l, b in enumerate(pyramids):
        K = np.kron(adaptive_pool_matrix(b, H), adaptive_pool_matrix(b, W))  # (bb, HW)
        U = np.kron(bilinear_matrix(H, b), bilinear_matrix(W, b))            # (HW, bb)
        KT[:, offs[l]:offs[l + 1]] = K.T
        UT = np.zeros((BBp, HW), np.float32)        # zero rows outside this level
        UT[offs[l]:offs[l + 1], :] = U.T
        uts.append(jnp.asarray(UT, compute_dtype))
    return jnp.asarray(KT, compute_dtype), uts, BBp


# ---------------------------------------------------------------------------
# Fused Pallas kernel: all pyramid levels + DMA passthrough, one batch elem.
# ---------------------------------------------------------------------------
def _make_ppm_kernel(num_levels: int, C: int, OC: int, compute_dtype):
    def kernel(x_ref, w_ref, kt_ref, *rest):
        # rest = (ut_0, ..., ut_{L-1}, o_ref, copy_sem)
        ut_refs = rest[:num_levels]
        o_ref = rest[num_levels]
        copy_sem = rest[num_levels + 1]

        # Input passthrough: DMA engine copies x into the output's first C
        # channels, overlapped with the MXU work below (no vreg ld/st slots).
        cp = pltpu.make_async_copy(x_ref, o_ref.at[:, pl.ds(0, C), :], copy_sem)
        cp.start()

        xc = x_ref[0].astype(compute_dtype)                       # (C, HW) bf16
        # One fused adaptive-avg-pool matmul for ALL pyramid levels: (C, BBp)
        pooled = jnp.dot(xc, kt_ref[...], preferred_element_type=jnp.float32)
        # Shared 1x1 conv (no bias) + ReLU, once for all levels: (OC, BBp)
        z = jnp.maximum(
            jnp.dot(w_ref[...], pooled, preferred_element_type=jnp.float32), 0.0)
        zc = z.astype(compute_dtype)                              # bf16 MXU operand

        # Per-level bilinear upsample + direct sliced store (no concat).
        # With C and OC multiples of 8 these stores are sublane-aligned and
        # lane-dense (HW multiple of 128) -> unmasked vst.
        for l in range(num_levels):
            y = jnp.dot(zc, ut_refs[l][...],
                        preferred_element_type=jnp.float32)       # (OC, HW)
            o_ref[0, C + l * OC: C + (l + 1) * OC, :] = y.astype(o_ref.dtype)

        cp.wait()

    return kernel


# ---------------------------------------------------------------------------
# Module forward (single fused pallas_call).
# ---------------------------------------------------------------------------
def pyramid_pooling_forward(x, w_conv, pyramids=(1, 2, 3, 6),
                            compute_dtype=jnp.bfloat16):
    """x: (N, C, H, W) NCHW; w_conv: (OC, C) 1x1 conv weight (no bias)."""
    N, C, H, W = x.shape
    HW = H * W
    OC = w_conv.shape[0]
    L = len(pyramids)
    C_out = C + L * OC
    itemsize = jnp.dtype(x.dtype).itemsize

    # Channels-major, NCHW-native flattening: free reshape, no transposes.
    xf = x.reshape(N, C, HW)
    w_c = jnp.asarray(w_conv, jnp.float32)                        # (OC, C)
    kt, uts, BBp = _build_constants(pyramids, H, W, compute_dtype)

    # Resident (grid-invariant) constants: single-buffer them.
    resident = dict(pipeline_mode=pl.Buffered(1))
    in_specs = [
        pl.BlockSpec((1, C, HW), lambda n: (n, 0, 0)),            # x, one batch elem
        pl.BlockSpec((OC, C), lambda n: (0, 0), **resident),      # conv weight
        pl.BlockSpec((HW, BBp), lambda n: (0, 0), **resident),    # fused K^T
    ]
    for _ in uts:                                                 # per-level U^T
        in_specs.append(pl.BlockSpec((BBp, HW), lambda n: (0, 0), **resident))

    # Cost estimate for XLA scheduling.
    flops = N * (2 * C * HW * BBp + 2 * OC * C * BBp + L * 2 * OC * BBp * HW)
    const_bytes = (w_c.size * 4 + kt.size * jnp.dtype(compute_dtype).itemsize
                   + sum(int(u.size) * jnp.dtype(compute_dtype).itemsize for u in uts))
    bytes_accessed = (N * C * HW + N * C_out * HW) * itemsize + int(const_bytes)

    # Explicit VMEM budget (v5e default scoped limit is only 16 MiB):
    # double-buffered x/out blocks + single-buffered constants + temporaries.
    x_blk = C * HW * itemsize
    o_blk = C_out * HW * itemsize
    tmp = C * HW * 2 + 2 * OC * HW * 4 + 2 * BBp * max(C, OC) * 4
    est = 2 * x_blk + 2 * o_blk + int(const_bytes) + tmp
    vmem_limit = int(min(56 * 2 ** 20, max(32 * 2 ** 20, 2 * est)))

    out = pl.pallas_call(
        _make_ppm_kernel(L, C, OC, compute_dtype),
        out_shape=jax.ShapeDtypeStruct((N, C_out, HW), x.dtype),
        grid=(N,),
        in_specs=in_specs,
        out_specs=pl.BlockSpec((1, C_out, HW), lambda n: (n, 0, 0)),
        scratch_shapes=[pltpu.SemaphoreType.DMA],                 # passthrough DMA sem
        compiler_params=pltpu.CompilerParams(
            dimension_semantics=("parallel",),
            vmem_limit_bytes=vmem_limit),
        cost_estimate=pl.CostEstimate(
            flops=int(flops), transcendentals=0,
            bytes_accessed=int(bytes_accessed)),
    )(xf, w_c, kt, *uts)

    return out.reshape(N, C_out, H, W)


# ---------------------------------------------------------------------------
# Plain-JAX reference (module semantics, same operand rounding, no Pallas).
# ---------------------------------------------------------------------------
def reference_forward(x, w_conv, pyramids=(1, 2, 3, 6),
                      compute_dtype=jnp.bfloat16):
    N, C, H, W = x.shape
    HW = H * W
    xc = x.reshape(N, C, HW).astype(compute_dtype)
    w_c = jnp.asarray(w_conv, jnp.float32)
    outs = [x]
    for b in pyramids:
        K = jnp.asarray(
            np.kron(adaptive_pool_matrix(b, H), adaptive_pool_matrix(b, W)),
            compute_dtype)                                        # (bb, HW)
        U = jnp.asarray(
            np.kron(bilinear_matrix(H, b), bilinear_matrix(W, b)),
            compute_dtype)                                        # (HW, bb)
        pooled = jnp.einsum("ncs,ps->ncp", xc, K,
                            preferred_element_type=jnp.float32)   # (N, C, bb)
        z = jnp.maximum(
            jnp.einsum("oc,ncp->nop", w_c, pooled,
                       preferred_element_type=jnp.float32), 0.0)  # (N, OC, bb)
        y = jnp.einsum("nop,sp->nos", z.astype(compute_dtype), U,
                       preferred_element_type=jnp.float32)        # (N, OC, HW)
        outs.append(y.reshape(N, -1, H, W).astype(x.dtype))
    return jnp.concatenate(outs, axis=1)


if __name__ == "__main__":
    # C chosen as a multiple of 8 so OC = C/4 = 8 keeps the per-level channel
    # stores sublane-aligned (offsets 32, 40, 48, 56).
    N, C, H, W = 2, 32, 16, 16
    pyramids = (1, 2, 3, 6)
    OC = C // len(pyramids)

    key = jax.random.PRNGKey(0)
    kx, kw = jax.random.split(key)
    x = jax.random.normal(kx, (N, C, H, W), jnp.float32)
    # deterministic synthetic 1x1 conv weight (PyTorch (OC, C, 1, 1) -> (OC, C))
    w_conv = jax.random.normal(kw, (OC, C), jnp.float32) * 0.1

    out = pyramid_pooling_forward(x, w_conv, pyramids)
    out = jax.block_until_ready(out)
    assert out.shape == (N, C + OC * len(pyramids), H, W), out.shape

    ref = reference_forward(x, w_conv, pyramids)
    np.testing.assert_allclose(np.asarray(out), np.asarray(ref),
                               rtol=5e-3, atol=5e-4)

    print("KERNEL_OK")
</pallas_src>

<mosaic_0001>
module attributes {stable_mosaic.version = 11 : i64} {
  func.func @kernel(%arg0: i32, %arg1: memref<1x32x256xf32, #tpu.memory_space<vmem>>, %arg2: memref<8x32xf32, #tpu.memory_space<vmem>>, %arg3: memref<256x128xbf16, #tpu.memory_space<vmem>>, %arg4: memref<128x256xbf16, #tpu.memory_space<vmem>>, %arg5: memref<128x256xbf16, #tpu.memory_space<vmem>>, %arg6: memref<128x256xbf16, #tpu.memory_space<vmem>>, %arg7: memref<128x256xbf16, #tpu.memory_space<vmem>>, %arg8: memref<1x64x256xf32, #tpu.memory_space<vmem>>, %arg9: memref<!tpu.dma_semaphore, #tpu.memory_space<semaphore_mem>>) attributes {dimension_semantics = [#tpu.dimension_semantics<parallel>], iteration_bounds = array<i64: 2>, scalar_prefetch = 0 : i64, scratch_operands = 1 : i64, tpu.core_type = #tpu.core_type<tc>, window_params = [{transform_indices = @transform_0, window_bounds = array<i64: 1, 32, 256>}, {pipeline_mode = #tpu.pipeline_mode<synchronous>, transform_indices = @transform_1, window_bounds = array<i64: 8, 32>}, {pipeline_mode = #tpu.pipeline_mode<synchronous>, transform_indices = @transform_2, window_bounds = array<i64: 256, 128>}, {pipeline_mode = #tpu.pipeline_mode<synchronous>, transform_indices = @transform_3, window_bounds = array<i64: 128, 256>}, {pipeline_mode = #tpu.pipeline_mode<synchronous>, transform_indices = @transform_4, window_bounds = array<i64: 128, 256>}, {pipeline_mode = #tpu.pipeline_mode<synchronous>, transform_indices = @transform_5, window_bounds = array<i64: 128, 256>}, {pipeline_mode = #tpu.pipeline_mode<synchronous>, transform_indices = @transform_6, window_bounds = array<i64: 128, 256>}, {transform_indices = @transform_7, window_bounds = array<i64: 1, 64, 256>}]} {
    %c0_i32 = arith.constant 0 : i32
    %c0_i32_0 = arith.constant 0 : i32
    %c0_i32_1 = arith.constant 0 : i32
    %0 = tpu.memref_slice %arg8[%c0_i32, %c0_i32_0, %c0_i32_1] : memref<1x64x256xf32, #tpu.memory_space<vmem>> -> memref<1x32x256xf32, #tpu.memory_space<vmem>>
    tpu.enqueue_dma source(%arg1 : memref<1x32x256xf32, #tpu.memory_space<vmem>>) target(%0 : memref<1x32x256xf32, #tpu.memory_space<vmem>>) target_semaphore(%arg9 : memref<!tpu.dma_semaphore, #tpu.memory_space<semaphore_mem>>)
    %c0 = arith.constant 0 : index
    %c0_2 = arith.constant 0 : index
    %c0_3 = arith.constant 0 : index
    %1 = vector.load %arg1[%c0, %c0_2, %c0_3] : memref<1x32x256xf32, #tpu.memory_space<vmem>>, vector<1x32x256xf32>
    %2 = vector.shape_cast %1 : vector<1x32x256xf32> to vector<32x256xf32>
    %3 = arith.truncf %2 : vector<32x256xf32> to vector<32x256xbf16>
    %c0_4 = arith.constant 0 : index
    %c0_5 = arith.constant 0 : index
    %4 = vector.load %arg3[%c0_4, %c0_5] : memref<256x128xbf16, #tpu.memory_space<vmem>>, vector<256x128xbf16>
    %cst = arith.constant dense<0.000000e+00> : vector<32x128xf32>
    %5 = tpu.matmul %3, %4, %cst {dimension_numbers = #tpu.dot_dimension_numbers<[1], [0], [0], [1], [0, 0, 1, 1], [], []>} : vector<32x256xbf16>, vector<256x128xbf16>, vector<32x128xf32> -> vector<32x128xf32>
    %c0_6 = arith.constant 0 : index
    %c0_7 = arith.constant 0 : index
    %6 = vector.load %arg2[%c0_6, %c0_7] : memref<8x32xf32, #tpu.memory_space<vmem>>, vector<8x32xf32>
    %cst_8 = arith.constant dense<0.000000e+00> : vector<8x128xf32>
    %7 = tpu.matmul %6, %5, %cst_8 {dimension_numbers = #tpu.dot_dimension_numbers<[1], [0], [0], [1], [0, 0, 1, 1], [], []>} : vector<8x32xf32>, vector<32x128xf32>, vector<8x128xf32> -> vector<8x128xf32>
    %cst_9 = arith.constant 0.000000e+00 : f32
    %8 = vector.broadcast %cst_9 : f32 to vector<8x128xf32>
    %9 = arith.maximumf %7, %8 : vector<8x128xf32>
    %10 = arith.truncf %9 : vector<8x128xf32> to vector<8x128xbf16>
    %c0_10 = arith.constant 0 : index
    %c0_11 = arith.constant 0 : index
    %11 = vector.load %arg4[%c0_10, %c0_11] : memref<128x256xbf16, #tpu.memory_space<vmem>>, vector<128x256xbf16>
    %cst_12 = arith.constant dense<0.000000e+00> : vector<8x256xf32>
    %12 = tpu.matmul %10, %11, %cst_12 {dimension_numbers = #tpu.dot_dimension_numbers<[1], [0], [0], [1], [0, 0, 1, 1], [], []>} : vector<8x128xbf16>, vector<128x256xbf16>, vector<8x256xf32> -> vector<8x256xf32>
    %c0_13 = arith.constant 0 : index
    %c32 = arith.constant 32 : index
    %c0_14 = arith.constant 0 : index
    %13 = vector.load %arg8[%c0_13, %c32, %c0_14] : memref<1x64x256xf32, #tpu.memory_space<vmem>>, vector<1x8x256xf32>
    %14 = vector.shape_cast %13 : vector<1x8x256xf32> to vector<8x256xf32>
    %15 = vector.shape_cast %12 : vector<8x256xf32> to vector<1x8x256xf32>
    tpu.vector_store %arg8[%c0_13, %c32, %c0_14], %15 {strides = array<i32>} : memref<1x64x256xf32, #tpu.memory_space<vmem>>, vector<1x8x256xf32>,
    %c0_15 = arith.constant 0 : index
    %c0_16 = arith.constant 0 : index
    %16 = vector.load %arg5[%c0_15, %c0_16] : memref<128x256xbf16, #tpu.memory_space<vmem>>, vector<128x256xbf16>
    %cst_17 = arith.constant dense<0.000000e+00> : vector<8x256xf32>
    %17 = tpu.matmul %10, %16, %cst_17 {dimension_numbers = #tpu.dot_dimension_numbers<[1], [0], [0], [1], [0, 0, 1, 1], [], []>} : vector<8x128xbf16>, vector<128x256xbf16>, vector<8x256xf32> -> vector<8x256xf32>
    %c0_18 = arith.constant 0 : index
    %c40 = arith.constant 40 : index
    %c0_19 = arith.constant 0 : index
    %18 = vector.load %arg8[%c0_18, %c40, %c0_19] : memref<1x64x256xf32, #tpu.memory_space<vmem>>, vector<1x8x256xf32>
    %19 = vector.shape_cast %18 : vector<1x8x256xf32> to vector<8x256xf32>
    %20 = vector.shape_cast %17 : vector<8x256xf32> to vector<1x8x256xf32>
    tpu.vector_store %arg8[%c0_18, %c40, %c0_19], %20 {strides = array<i32>} : memref<1x64x256xf32, #tpu.memory_space<vmem>>, vector<1x8x256xf32>,
    %c0_20 = arith.constant 0 : index
    %c0_21 = arith.constant 0 : index
    %21 = vector.load %arg6[%c0_20, %c0_21] : memref<128x256xbf16, #tpu.memory_space<vmem>>, vector<128x256xbf16>
    %cst_22 = arith.constant dense<0.000000e+00> : vector<8x256xf32>
    %22 = tpu.matmul %10, %21, %cst_22 {dimension_numbers = #tpu.dot_dimension_numbers<[1], [0], [0], [1], [0, 0, 1, 1], [], []>} : vector<8x128xbf16>, vector<128x256xbf16>, vector<8x256xf32> -> vector<8x256xf32>
    %c0_23 = arith.constant 0 : index
    %c48 = arith.constant 48 : index
    %c0_24 = arith.constant 0 : index
    %23 = vector.load %arg8[%c0_23, %c48, %c0_24] : memref<1x64x256xf32, #tpu.memory_space<vmem>>, vector<1x8x256xf32>
    %24 = vector.shape_cast %23 : vector<1x8x256xf32> to vector<8x256xf32>
    %25 = vector.shape_cast %22 : vector<8x256xf32> to vector<1x8x256xf32>
    tpu.vector_store %arg8[%c0_23, %c48, %c0_24], %25 {strides = array<i32>} : memref<1x64x256xf32, #tpu.memory_space<vmem>>, vector<1x8x256xf32>,
    %c0_25 = arith.constant 0 : index
    %c0_26 = arith.constant 0 : index
    %26 = vector.load %arg7[%c0_25, %c0_26] : memref<128x256xbf16, #tpu.memory_space<vmem>>, vector<128x256xbf16>
    %cst_27 = arith.constant dense<0.000000e+00> : vector<8x256xf32>
    %27 = tpu.matmul %10, %26, %cst_27 {dimension_numbers = #tpu.dot_dimension_numbers<[1], [0], [0], [1], [0, 0, 1, 1], [], []>} : vector<8x128xbf16>, vector<128x256xbf16>, vector<8x256xf32> -> vector<8x256xf32>
    %c0_28 = arith.constant 0 : index
    %c56 = arith.constant 56 : index
    %c0_29 = arith.constant 0 : index
    %28 = vector.load %arg8[%c0_28, %c56, %c0_29] : memref<1x64x256xf32, #tpu.memory_space<vmem>>, vector<1x8x256xf32>
    %29 = vector.shape_cast %28 : vector<1x8x256xf32> to vector<8x256xf32>
    %30 = vector.shape_cast %27 : vector<8x256xf32> to vector<1x8x256xf32>
    tpu.vector_store %arg8[%c0_28, %c56, %c0_29], %30 {strides = array<i32>} : memref<1x64x256xf32, #tpu.memory_space<vmem>>, vector<1x8x256xf32>,
    %c0_i32_30 = arith.constant 0 : i32
    %c0_i32_31 = arith.constant 0 : i32
    %c0_i32_32 = arith.constant 0 : i32
    %31 = tpu.memref_slice %arg8[%c0_i32_30, %c0_i32_31, %c0_i32_32] : memref<1x64x256xf32, #tpu.memory_space<vmem>> -> memref<1x32x256xf32, #tpu.memory_space<vmem>>
    tpu.wait_dma2 semaphore(%arg9 : memref<!tpu.dma_semaphore, #tpu.memory_space<semaphore_mem>>) src(%arg1 : memref<1x32x256xf32, #tpu.memory_space<vmem>>) dst(%31 : memref<1x32x256xf32, #tpu.memory_space<vmem>>)
    return
  }
  func.func @transform_0(%arg0: i32) -> (i32, i32, i32) {
    %c0_i32 = arith.constant 0 : i32
    %c0_i32_0 = arith.constant 0 : i32
    %c0_i32_1 = arith.constant 0 : i32
    return %arg0, %c0_i32, %c0_i32_0 : i32, i32, i32
  }
  func.func @transform_1(%arg0: i32) -> (i32, i32) {
    %c0_i32 = arith.constant 0 : i32
    %c0_i32_0 = arith.constant 0 : i32
    %c0_i32_1 = arith.constant 0 : i32
    return %c0_i32, %c0_i32_0 : i32, i32
  }
  func.func @transform_2(%arg0: i32) -> (i32, i32) {
    %c0_i32 = arith.constant 0 : i32
    %c0_i32_0 = arith.constant 0 : i32
    %c0_i32_1 = arith.constant 0 : i32
    return %c0_i32, %c0_i32_0 : i32, i32
  }
  func.func @transform_3(%arg0: i32) -> (i32, i32) {
    %c0_i32 = arith.constant 0 : i32
    %c0_i32_0 = arith.constant 0 : i32
    %c0_i32_1 = arith.constant 0 : i32
    return %c0_i32, %c0_i32_0 : i32, i32
  }
  func.func @transform_4(%arg0: i32) -> (i32, i32) {
    %c0_i32 = arith.constant 0 : i32
    %c0_i32_0 = arith.constant 0 : i32
    %c0_i32_1 = arith.constant 0 : i32
    return %c0_i32, %c0_i32_0 : i32, i32
  }
  func.func @transform_5(%arg0: i32) -> (i32, i32) {
    %c0_i32 = arith.constant 0 : i32
    %c0_i32_0 = arith.constant 0 : i32
    %c0_i32_1 = arith.constant 0 : i32
    return %c0_i32, %c0_i32_0 : i32, i32
  }
  func.func @transform_6(%arg0: i32) -> (i32, i32) {
    %c0_i32 = arith.constant 0 : i32
    %c0_i32_0 = arith.constant 0 : i32
    %c0_i32_1 = arith.constant 0 : i32
    return %c0_i32, %c0_i32_0 : i32, i32
  }
  func.func @transform_7(%arg0: i32) -> (i32, i32, i32) {
    %c0_i32 = arith.constant 0 : i32
    %c0_i32_0 = arith.constant 0 : i32
    %c0_i32_1 = arith.constant 0 : i32
    return %arg0, %c0_i32, %c0_i32_0 : i32, i32, i32
  }
}

</mosaic_0001>

<bundles_post_ra>
// kernel: tpu_custom_call.1
= control target key start
LH: loop header
LB: loop body
LE: loop exit
PB: predicated region body
PF: predicated region fallthrough
CT: control target
= control target key end

     0   :  { %12 = vsyncpa [#allocation4], 0  ;;  %s2536_s0 = inlined_call_operand.hbm [shape: f32[2,32,256], index: 0, kind: input, shape index: {}]   ;;  %s2537_s1 = inlined_call_operand.hbm [shape: f32[8,32], index: 1, kind: input, shape index: {}]   ;;  %s2538_s2 = inlined_call_operand.hbm [shape: bf16[256,128], index: 2, kind: input, shape index: {}]   ;;  %s2539_s3 = inlined_call_operand.hbm [shape: bf16[128,256], index: 3, kind: input, shape index: {}]   ;;  %s2540_s4 = inlined_call_operand.hbm [shape: bf16[128,256], index: 4, kind: input, shape index: {}]   ;;  %s2541_s5 = inlined_call_operand.hbm [shape: bf16[128,256], index: 5, kind: input, shape index: {}]   ;;  %s2542_s6 = inlined_call_operand.hbm [shape: bf16[128,256], index: 6, kind: input, shape index: {}]   ;;  %s2543_s7 = inlined_call_operand.hbm [shape: f32[2,64,256], index: 7, kind: output, shape index: {}]  }
   0x1   :  { %14 = vsyncpa [#allocation4 + $0x1], 0 }
   0x2   :  { %15 = vsyncpa [#allocation7], 0 }
   0x3   :  { %16 = vsyncpa [#allocation10], 0 }
   0x4   :  { %17 = vsyncpa [#allocation13], 0 }
   0x5   :  { %18 = vsyncpa [#allocation5], 0 }
   0x6   :  { %20 = vsyncpa [#allocation5 + $0x1], 0  ;;  %s2155_s24 = smov 0   ;;  %s2157_s25 = smov 0  }
   0x7   :  { %s2159_s26 = smov 0   ;;  %s2161_s27 = smov 0  }
   0x8 LB: > { %s2095_s28 = smov [#allocation6]   ;;  %s2176_s30 = sadd.s32 4294967295, %s2093_s27   ;;  %s2093_s27 = sphi %s2161_s27, %s2572_s27   ;;  %s2089_s26 = sphi %s2159_s26, %s2571_s26   ;;  %s2085_s25 = sphi %s2157_s25, %s2570_s25   ;;  %s2081_s24 = sphi %s2155_s24, %s2569_s24  }
   0x9   : > { %s222_s29 = sshll.u32 %s2095_s28, 4  ;;  %p1425_p0 = scmp.ge.s32.totalorder %s2093_s27, 1  ;;  %s223_s29 = int_to_ptr.vmem [resolvable:$true] %s222_s29 }
   0xa   : > { %p2544_p1 = scmp.eq.s32.totalorder %s2176_s30, 0  ;;  %p209_p2 = scmp.lt.s32.totalorder %s2093_s27, 3 }
   0xb   : > { %s2096_s9 = smov [#allocation9]   ;;  %s2097_s12 = smov [#allocation12]  }
   0xc   : > { %p2181_p3 = pnand %p1425_p0, %p209_p2  ;;  %s245_s10 = sshll.u32 %s2096_s9, 4  ;;  %s2188_s10 = int_to_ptr.vmem [resolvable:$true] %s245_s10 }
   0xd   : > { %s271_s13 = sshll.u32 %s2097_s12, 4  ;;  %s1815_s16 = scalar_lea.hbm %s2537_s1, 128  ;;  %s2196_s13 = int_to_ptr.vmem [resolvable:$true] %s271_s13 }
   0xe   : > { %s2549_s8 = scalar_select %p2181_p3, 1, 0 }
   0xf   : > { %p1612_p5 = pneg %p2181_p3  ;;  %p1816_p7 = scmp.ne.s32.totalorder %s2537_s1, %s1815_s16 }
  0x10   : > { %p1822_p11 = scmp.lt.u32.totalorder %s1815_s16, %s2537_s1 }
  0x11   : > { %p2192_p6 = pnand %p1612_p5, %p2544_p1 }
  0x13   : > { %p2206_p8 = pneg %p2192_p6 }
  0x15   : > { %p1818_p9 = pnand %p2206_p8, %p1816_p7 }
  0x17   : > { %p1819_p10 = pneg %p1818_p9 }
  0x19   : > { %p1824_p12 = pnand %p1822_p11, %p1819_p10 }
  0x1b   : > { %1827 = shalt.err (!%p1824_p12)
}
  0x1c   : > { %s1828_s22 = scalar_lea.vmem %s223_s29, 128  ;;  %p1836_p5 = scmp.lt.s32.totalorder %s223_s29, %s223_s29 }
  0x1d   : > { %p1829_p13 = scmp.ne.s32.totalorder %s223_s29, %s1828_s22  ;;  %p1837_p4 = scmp.lt.s32.totalorder %s1828_s22, %s1828_s22 }
  0x1f   : > { %p1831_p0 = pnand %p1829_p13, %p2206_p8  ;;  %p1838_p1 = por %p1837_p4, %p1836_p5 }
  0x21   : > { %p1832_p2 = pneg %p1831_p0 }
  0x23   : > { %p1839_p3 = pnand %p1838_p1, %p1832_p2 }
  0x25   : > { %1842 = shalt.err (!%p1839_p3)
}
  0x26   : > { %1615 = dma.hbm_to_vmem [thread:$0]  (!%p2192_p6), %s2537_s1, 128, %s223_s29, [#allocation7]  }
  0x27   : > { %s1843_s14 = scalar_lea.hbm %s2539_s3, 2048 }
  0x28   : > { %p1844_p7 = scmp.ne.s32.totalorder %s2539_s3, %s1843_s14  ;;  %p1850_p1 = scmp.lt.u32.totalorder %s1843_s14, %s2539_s3 }
  0x2a   : > { %p1846_p9 = pnand %p1844_p7, %p2206_p8 }
  0x2c   : > { %p1847_p4 = pneg %p1846_p9 }
  0x2e   : > { %p1852_p3 = pnand %p1850_p1, %p1847_p4 }
  0x30   : > { %1855 = shalt.err (!%p1852_p3)
}
  0x31   : > { %s1856_s29 = scalar_lea.vmem %s2188_s10, 2048  ;;  %p1864_p13 = scmp.lt.s32.totalorder %s2188_s10, %s2188_s10 }
  0x32   : > { %p1857_p10 = scmp.ne.s32.totalorder %s2188_s10, %s1856_s29  ;;  %p1865_p0 = scmp.lt.s32.totalorder %s1856_s29, %s1856_s29 }
  0x34   : > { %p1859_p11 = pnand %p1857_p10, %p2206_p8  ;;  %p1866_p2 = por %p1865_p0, %p1864_p13 }
  0x36   : > { %p1860_p12 = pneg %p1859_p11 }
  0x38   : > { %p1867_p5 = pnand %p1866_p2, %p1860_p12 }
  0x3a   : > { %1870 = shalt.err (!%p1867_p5)
}
  0x3b   : > { %s2546_s20 = smov 128   ;;  %s2099_s21 = smov 8  }
  0x3c   : > { %1621 = dma.hbm_to_vmem [thread:$0]  (!%p2192_p6), %s2539_s3, 2048, %s2188_s10, [#allocation10], %s2546_s20, %s2546_s20, %s2099_s21  }
  0x3d   : > { %s1871_s12 = scalar_lea.hbm %s2541_s5, 2048 }
  0x3e   : > { %p1872_p7 = scmp.ne.s32.totalorder %s2541_s5, %s1871_s12  ;;  %p1878_p1 = scmp.lt.u32.totalorder %s1871_s12, %s2541_s5 }
  0x40   : > { %p1874_p9 = pnand %p1872_p7, %p2206_p8 }
  0x42   : > { %p1875_p4 = pneg %p1874_p9 }
  0x44   : > { %p1880_p3 = pnand %p1878_p1, %p1875_p4 }
  0x46   : > { %1883 = shalt.err (!%p1880_p3)
}
  0x47   : > { %s1884_s10 = scalar_lea.vmem %s2196_s13, 2048  ;;  %p1892_p13 = scmp.lt.s32.totalorder %s2196_s13, %s2196_s13 }
  0x48   : > { %p1885_p10 = scmp.ne.s32.totalorder %s2196_s13, %s1884_s10  ;;  %p1893_p0 = scmp.lt.s32.totalorder %s1884_s10, %s1884_s10 }
  0x4a   : > { %p1887_p11 = pnand %p1885_p10, %p2206_p8  ;;  %p1894_p2 = por %p1893_p0, %p1892_p13 }
  0x4c   : > { %p1888_p12 = pneg %p1887_p11 }
  0x4e   : > { %p1895_p5 = pnand %p1894_p2, %p1888_p12 }
  0x50   : > { %1898 = shalt.err (!%p1895_p5)
}
  0x51   : > { %1627 = dma.hbm_to_vmem [thread:$0]  (!%p2192_p6), %s2541_s5, 2048, %s2196_s13, [#allocation13], %s2546_s20, %s2546_s20, %s2099_s21  }
  0x52   : > { %s2100_s22 = smov [#allocation8]   ;;  %s1899_s12 = scalar_lea.hbm %s2538_s2, 2048 }
  0x53   : > { %s232_s23 = sshll.u32 %s2100_s22, 4  ;;  %p1900_p7 = scmp.ne.s32.totalorder %s2538_s2, %s1899_s12  ;;  %s233_s23 = int_to_ptr.vmem [resolvable:$true] %s232_s23 }
  0x54   : > { %p1906_p1 = scmp.lt.u32.totalorder %s1899_s12, %s2538_s2 }
  0x55   : > { %p1902_p9 = pnand %p1900_p7, %p2206_p8 }
  0x57   : > { %p1903_p4 = pneg %p1902_p9 }
  0x59   : > { %p1908_p3 = pnand %p1906_p1, %p1903_p4 }
  0x5b   : > { %1911 = shalt.err (!%p1908_p3)
}
  0x5c   : > { %s1912_s13 = scalar_lea.vmem %s233_s23, 2048  ;;  %p1920_p13 = scmp.lt.s32.totalorder %s233_s23, %s233_s23 }
  0x5d   : > { %p1913_p10 = scmp.ne.s32.totalorder %s233_s23, %s1912_s13  ;;  %p1921_p0 = scmp.lt.s32.totalorder %s1912_s13, %s1912_s13 }
  0x5f   : > { %p1915_p11 = pnand %p1913_p10, %p2206_p8  ;;  %p1922_p2 = por %p1921_p0, %p1920_p13 }
  0x61   : > { %p1916_p12 = pneg %p1915_p11 }
  0x63   : > { %p1923_p5 = pnand %p1922_p2, %p1916_p12 }
  0x65   : > { %1926 = shalt.err (!%p1923_p5)
}
  0x66   : > { %s2101_s10 = smov 64   ;;  %s2102_s18 = smov 4  }
  0x67   : > { %1618 = dma.hbm_to_vmem [thread:$0]  (!%p2192_p6), %s2538_s2, 2048, %s233_s23, [#allocation7], %s2101_s10, %s2101_s10, %s2102_s18  }
  0x68   : > { %s2103_s28 = smov [#allocation11]   ;;  %s2104_s12 = smov [#allocation14]  }
  0x69   : > { %s258_s9 = sshll.u32 %s2103_s28, 4  ;;  %s284_s14 = sshll.u32 %s2104_s12, 4  ;;  %s259_s9 = int_to_ptr.vmem [resolvable:$true] %s258_s9  ;;  %s2292_s14 = int_to_ptr.vmem [resolvable:$true] %s284_s14 }
  0x6a   : > { %s1927_s17 = scalar_lea.hbm %s2540_s4, 2048 }
  0x6b   : > { %p1928_p7 = scmp.ne.s32.totalorder %s2540_s4, %s1927_s17  ;;  %p1934_p1 = scmp.lt.u32.totalorder %s1927_s17, %s2540_s4 }
  0x6d   : > { %p1930_p9 = pnand %p1928_p7, %p2206_p8 }
  0x6f   : > { %p1931_p4 = pneg %p1930_p9 }
  0x71   : > { %p1936_p3 = pnand %p1934_p1, %p1931_p4 }
  0x73   : > { %1939 = shalt.err (!%p1936_p3)
}
  0x74   : > { %s1940_s10 = scalar_lea.vmem %s259_s9, 2048  ;;  %p1948_p13 = scmp.lt.s32.totalorder %s259_s9, %s259_s9 }
  0x75   : > { %p1941_p10 = scmp.ne.s32.totalorder %s259_s9, %s1940_s10  ;;  %p1949_p0 = scmp.lt.s32.totalorder %s1940_s10, %s1940_s10 }
  0x77   : > { %p1943_p11 = pnand %p1941_p10, %p2206_p8  ;;  %p1950_p2 = por %p1949_p0, %p1948_p13 }
  0x79   : > { %p1944_p12 = pneg %p1943_p11 }
  0x7b   : > { %p1951_p5 = pnand %p1950_p2, %p1944_p12 }
  0x7d   : > { %1954 = shalt.err (!%p1951_p5)
}
  0x7e   : > { %s2552_s20 = smov 128   ;;  %s1955_s15 = scalar_lea.hbm %s2542_s6, 2048 }
  0x7f   : > { %1624 = dma.hbm_to_vmem [thread:$0]  (!%p2192_p6), %s2540_s4, 2048, %s259_s9, [#allocation10], %s2552_s20, %s2552_s20, %s2099_s21  }
  0x80   : > { %p1956_p7 = scmp.ne.s32.totalorder %s2542_s6, %s1955_s15  ;;  %p1962_p1 = scmp.lt.u32.totalorder %s1955_s15, %s2542_s6 }
  0x82   : > { %p1958_p9 = pnand %p1956_p7, %p2206_p8 }
  0x84   : > { %p1959_p4 = pneg %p1958_p9 }
  0x86   : > { %p1964_p3 = pnand %p1962_p1, %p1959_p4 }
  0x88   : > { %1967 = shalt.err (!%p1964_p3)
}
  0x89   : > { %s1968_s9 = scalar_lea.vmem %s2292_s14, 2048  ;;  %p1976_p13 = scmp.lt.s32.totalorder %s2292_s14, %s2292_s14 }
  0x8a   : > { %p1969_p10 = scmp.ne.s32.totalorder %s2292_s14, %s1968_s9  ;;  %p1977_p0 = scmp.lt.s32.totalorder %s1968_s9, %s1968_s9 }
  0x8c   : > { %p1971_p11 = pnand %p1969_p10, %p2206_p8  ;;  %p1978_p2 = por %p1977_p0, %p1976_p13 }
  0x8e   : > { %p1972_p12 = pneg %p1971_p11 }
  0x90   : > { %p1979_p5 = pnand %p1978_p2, %p1972_p12 }
  0x92   : > { %1982 = shalt.err (!%p1979_p5)
}
  0x93   : > { %1630 = dma.hbm_to_vmem [thread:$0]  (!%p2192_p6), %s2542_s6, 2048, %s2292_s14, [#allocation13], %s2552_s20, %s2552_s20, %s2099_s21  }
  0x94   : > { %s1424_s11 = sadd.s32 4294967294, %s2093_s27   ;;  %s2343_s19 = sadd.s32 1, %s2093_s27  }
  0x95   : > { %s30_s18 = ssub.s32 %s2093_s27, %s2343_s19  ;;  %s33_s22 = sadd.s32 1, %s2089_s26 }
  0x96   : > { %p31_p8 = scmp.eq.s32.totalorder %s30_s18, 0  ;;  %p40_p7 = scmp.ne.s32.totalorder %s2089_s26, %s2085_s25 }
  0x97   : > { %p41_p9 = scmp.eq.s32.totalorder %s2093_s27, 0  ;;  %p46_p4 = scmp.ne.s32.totalorder %s2085_s25, %s2081_s24 }
  0x98   : > { %s2354_s28 = scalar_select %p31_p8, %s2089_s26, %s33_s22  }
  0x99   : > { %p2356_p1 = por %p41_p9, %p40_p7  ;;  %p2554_p3 = scmp.eq.s32.totalorder %s2176_s30, 0 }
  0x9a   : > { %p196_p10 = scmp.eq.s32.totalorder %s2176_s30, 1  ;;  %p202_p11 = scmp.eq.s32.totalorder %s1424_s11, 1 }
  0x9b   : > { %p2362_p6 = por %p2554_p3, %p46_p4  ;;  %p1645_p12 = scmp.lt.s32.totalorder %s2093_s27, 2 }
  0x9c   : > { %s298_s14 = sand.u32 1, %s2089_s26   ;;  %p2369_p13 = por %p196_p10, %p40_p7 }
  0x9d   : > { %p2373_p0 = por %p202_p11, %p46_p4  ;;  %s1433_s16 = sshll.u32 %s298_s14, 6 }
  0x9e   : > { %s2556_s20 = scalar_select %p2369_p13, 1, 0 }
  0x9f   : > { %s2557_s15 = scalar_select %p2373_p0, 1, 0 }
  0xa0   : > { %s1532_s17 = sshll.u32 %s2093_s27, 10  ;;  %s302_s23 = scalar_lea.vmem [#allocation3], %s1433_s16 }
  0xa1   : > { %s2381_s9 = scalar_lea.hbm %s2536_s0, %s1532_s17  ;;  %s309_s10 = sshll.u32 %s302_s23, 4  ;;  %s2383_s10 = int_to_ptr.vmem [resolvable:$true] %s309_s10 }
  0xa2   : > { %p2387_p2 = pnand %p1645_p12, %p2356_p1  ;;  %s2391_s18 = scalar_lea.sflag [#allocation4], %s298_s14 }
  0xa3   : > { %s1983_s22 = scalar_lea.hbm %s2381_s9, 1024  ;;  %s1988_s12 = scalar_lea.hbm %s2536_s0, 2048 }
  0xa4   : > { %p1984_p5 = scmp.ne.s32.totalorder %s2381_s9, %s1983_s22  ;;  %p1985_p8 = pneg %p2387_p2 }
  0xa5   : > { %p1989_p4 = scmp.lt.u32.totalorder %s2381_s9, %s2536_s0  ;;  %p1990_p1 = scmp.lt.u32.totalorder %s1988_s12, %s1983_s22 }
  0xa6   : > { %p1986_p7 = pnand %p1985_p8, %p1984_p5  ;;  %p1992_p10 = scmp.lt.u32.totalorder %s1983_s22, %s2381_s9 }
  0xa7   : > { %p1991_p3 = por %p1990_p1, %p1989_p4 }
  0xa8   : > { %p1987_p9 = pneg %p1986_p7 }
  0xa9   : > { %p1993_p11 = por %p1992_p10, %p1991_p3 }
  0xab   : > { %p1994_p12 = pnand %p1993_p11, %p1987_p9 }
  0xad   : > { %1997 = shalt.err (!%p1994_p12)
}
  0xae   : > { %s1998_s14 = scalar_lea.vmem %s2383_s10, 1024  ;;  %s2105_s23 = smov [#allocation3]  }
  0xaf   : > { %p1999_p5 = scmp.ne.s32.totalorder %s2383_s10, %s1998_s14  ;;  %s2003_s16 = sshll.u32 %s2105_s23, 4  ;;  %s2004_s16 = int_to_ptr.vmem [resolvable:$false] %s2003_s16 }
  0xb0   : > { %s2005_s17 = scalar_lea.vmem %s2004_s16, 2048  ;;  %p2006_p13 = scmp.lt.s32.totalorder %s2383_s10, %s2004_s16 }
  0xb1   : > { %p2001_p7 = pnand %p1999_p5, %p1985_p8  ;;  %p2007_p4 = scmp.lt.s32.totalorder %s2005_s17, %s1998_s14 }
  0xb3   : > { %p2002_p0 = pneg %p2001_p7  ;;  %p2008_p1 = por %p2007_p4, %p2006_p13 }
  0xb5   : > { %p2009_p3 = pnand %p2008_p1, %p2002_p0 }
  0xb7   : > { %2012 = shalt.err (!%p2009_p3)
}
  0xb8   : > { %s2106_s22 = smov 256   ;;  %s2107_s12 = smov 16  }
  0xb9   : > { %1634 = dma.hbm_to_vmem [thread:$0]  (!%p2387_p2), %s2381_s9, 1024, %s2383_s10, %s2391_s18, %s2106_s22, %s2106_s22, %s2107_s12  }
  0xba   : > { %p2559_p8 = scmp.ne.s32.totalorder %s2549_s8, 0 }
  0xbb   : > { %s2422_s13 = sand.u32 (!%p2559_p8), 1, %s2085_s25  }
  0xbc   : > { %321 = sbr.rel (%p2559_p8) target bundleno = 965 (0x3c5), region = 48  ;;  %s1437_s29 = sshll.u32 (!%p2559_p8), %s2422_s13, 6 }
  0xbd   : > { %s324_s14 = scalar_lea.sflag (!%p2559_p8), [#allocation4], %s2422_s13  ;;  %s2426_s23 = scalar_lea.vmem (!%p2559_p8), [#allocation3], %s1437_s29 }
  0xc3   : > { %2058 = dma.done.wait (%p2362_p6), %s324_s14, 1024  }
  0xc4   : > { %2060 = vsyncadd (%p2362_p6), %s324_s14, 4294966272  ;;  %p2560_p13 = scmp.eq.s32.totalorder %s2176_s30, 0 }
  0xc6   : > { %2062 = dma.done.wait (%p2560_p13), [#allocation7], 2176   ;;  %p2561_p0 = pmov %p2560_p13 }
  0xc8   : > { %2064 = vsyncadd (%p2561_p0), [#allocation7], 4294965120  ;;  %p2562_p2 = pmov %p2561_p0 }
  0xc9   : > { %p2563_p9 = pmov %p2561_p0 }
  0xca   : > { %2066 = dma.done.wait (%p2562_p2), [#allocation10], 4096  }
  0xcb   : > { %2068 = vsyncadd (%p2563_p9), [#allocation10], 4294963200  ;;  %p2564_p10 = pmov %p2561_p0 }
  0xcc   : > { %p2565_p11 = pmov %p2561_p0 }
  0xcd   : > { %2070 = dma.done.wait (%p2564_p10), [#allocation13], 4096  }
  0xce   : > { %2072 = vsyncadd (%p2565_p11), [#allocation13], 4294963200  ;;  %s1444_s8 = sshll.u32 %s2422_s13, 7  ;;  %v415_v0 = vld [vmem:[%s2426_s23] sm:$0xff]  ;;  %v417_v1 = vld [vmem:[%s2426_s23 + $0x8] sm:$0xff] }
  0xcf   : > { %v419_v2 = vld [vmem:[%s2426_s23 + $0x10] sm:$0xff]  ;;  %s2448_s21 = scalar_lea.vmem [#allocation15], %s1444_s8  ;;  %v421_v3 = vld [vmem:[%s2426_s23 + $0x18] sm:$0xff]  ;;  %v423_v4 = vld [vmem:[%s2426_s23 + $0x20] sm:$0xff] }
  0xd0   : > { %416 = vst [vmem:[%s2448_s21] sm:$0xff] %v415_v0  ;;  %418 = vst [vmem:[%s2448_s21 + $0x8] sm:$0xff] %v417_v1  ;;  %v425_v5 = vld [vmem:[%s2426_s23 + $0x28] sm:$0xff]  ;;  %v427_v6 = vld [vmem:[%s2426_s23 + $0x30] sm:$0xff] }
  0xd1   : > { %420 = vst [vmem:[%s2448_s21 + $0x10] sm:$0xff] %v419_v2  ;;  %422 = vst [vmem:[%s2448_s21 + $0x18] sm:$0xff] %v421_v3  ;;  %v429_v7 = vld [vmem:[%s2426_s23 + $0x38] sm:$0xff] }
  0xd2   : > { %424 = vst [vmem:[%s2448_s21 + $0x20] sm:$0xff] %v423_v4  ;;  %426 = vst [vmem:[%s2448_s21 + $0x28] sm:$0xff] %v425_v5 }
  0xd3   : > { %428 = vst [vmem:[%s2448_s21 + $0x30] sm:$0xff] %v427_v6  ;;  %430 = vst [vmem:[%s2448_s21 + $0x38] sm:$0xff] %v429_v7 }
  0xd4   : > { %438 = vsyncadd [#allocation2], 1024  ;;  %v1703_v8 = vld [vmem:[#allocation8 + $0x40] sm:$0xff]   ;;  %v1705_v10 = vld [vmem:[#allocation8 + $0x48] sm:$0xff]   ;;  %v2108_v36 = vmov 0.0|0.0   ;;  %vm2109_vm0 = vmmov 0  }
  0xd5   : > { %v1704_v9 = vld [vmem:[#allocation8] sm:$0xff]   ;;  %1534 = vmatprep.subr.bf16.mxu0 %v1703_v8  ;;  %v1706_v11 = vld [vmem:[#allocation8 + $0x8] sm:$0xff]   ;;  %v1707_v12 = vld [vmem:[#allocation8 + $0x50] sm:$0xff]   ;;  %1578 = vmatprep.subr.bf16.mxu1 %v2108_v36  ;;  %v2110_v37 = vmov 0.0   ;;  %vm629_vm1 = vcmask 261120  }
  0xd6   : > { %1535 = vmatpush3.bf16.msra.mxu0 %v1704_v9  ;;  %v1708_v13 = vld [vmem:[#allocation8 + $0x10] sm:$0xff]   ;;  %v1709_v14 = vld [vmem:[#allocation8 + $0x58] sm:$0xff]   ;;  %v1711_v16 = vld [vmem:[#allocation8 + $0x60] sm:$0xff]   ;;  %1575 = vmatprep.mubr.msk.f32.mxu1 %vm2109_vm0, %v2110_v37 }
  0xd7   : > { %1536 = vmatprep.subr.bf16.mxu0 %v1705_v10  ;;  %v1710_v15 = vld [vmem:[#allocation8 + $0x18] sm:$0xff]   ;;  %v1712_v17 = vld [vmem:[#allocation8 + $0x20] sm:$0xff]   ;;  %v442_v19 = vld [vmem:[%s2426_s23 + $0x18] sm:$0xff] }
  0xd8   : > { %v440_v18 = vld [vmem:[%s2426_s23 + $0x8] sm:$0xff]  ;;  %v1713_v20 = vld [vmem:[#allocation8 + $0x68] sm:$0xff]   ;;  %v1715_v23 = vld [vmem:[#allocation8 + $0x70] sm:$0xff]  }
  0xd9   : > { %v448_v21 = vpack.c.bf16 %v442_v19, %v440_v18  ;;  %v1714_v22 = vld [vmem:[#allocation8 + $0x28] sm:$0xff]   ;;  %v1716_v24 = vld [vmem:[#allocation8 + $0x30] sm:$0xff]   ;;  %v1717_v25 = vld [vmem:[#allocation8 + $0x78] sm:$0xff]  }
  0xda   : > { %1537 = vmatpush3.bf16.msra.mxu0 %v1706_v11  ;;  %v1718_v26 = vld [vmem:[#allocation8 + $0x38] sm:$0xff]   ;;  %v441_v28 = vld [vmem:[%s2426_s23 + $0x10] sm:$0xff]  ;;  %v444_v29 = vld [vmem:[%s2426_s23 + $0x28] sm:$0xff] }
  0xdb   : > { %1538 = vmatprep.subr.bf16.mxu0 %v1707_v12  ;;  %611 = vmatprep.mubr.bf16.mxu0 %v448_v21  ;;  %v439_v27 = vld [vmem:[%s2426_s23] sm:$0xff]  ;;  %v446_v30 = vld [vmem:[%s2426_s23 + $0x38] sm:$0xff]  ;;  %v445_v34 = vld [vmem:[%s2426_s23 + $0x30] sm:$0xff] }
  0xdc   : > { %v447_v31 = vpack.c.bf16 %v441_v28, %v439_v27  ;;  %v450_v32 = vpack.c.bf16 %v446_v30, %v444_v29  ;;  %v443_v33 = vld [vmem:[%s2426_s23 + $0x20] sm:$0xff]  ;;  %v1722_v38 = vld [vmem:[#allocation11] ss:$8 sps:$4 sm:$0xff]   ;;  %v1724_v39 = vld [vmem:[#allocation11 + $0x4] ss:$8 sps:$4 sm:$0xff]  }
  0xdd   : > { %v449_v35 = vpack.c.bf16 %v445_v34, %v443_v33  ;;  %v1730_v40 = vld [vmem:[#allocation11 + $0x14] ss:$8 sps:$4 sm:$0xff]   ;;  %v1728_v41 = vld [vmem:[#allocation11 + $0x10] ss:$8 sps:$4 sm:$0xff]   ;;  %v1736_v42 = vld [vmem:[#allocation11 + $0x24] ss:$8 sps:$4 sm:$0xff]  }
  0xde   : > { %1539 = vmatpush3.bf16.msra.mxu0 %v1708_v13  ;;  %v1734_v43 = vld [vmem:[#allocation11 + $0x20] ss:$8 sps:$4 sm:$0xff]   ;;  %v1742_v44 = vld [vmem:[#allocation11 + $0x34] ss:$8 sps:$4 sm:$0xff]   ;;  %v1740_v45 = vld [vmem:[#allocation11 + $0x30] ss:$8 sps:$4 sm:$0xff]  }
  0xdf   : > { %1540 = vmatprep.subr.bf16.mxu0 %v1709_v14  ;;  %v1748_v46 = vld [vmem:[#allocation11 + $0x44] ss:$8 sps:$4 sm:$0xff]   ;;  %v1746_v47 = vld [vmem:[#allocation11 + $0x40] ss:$8 sps:$4 sm:$0xff]   ;;  %v1754_v48 = vld [vmem:[#allocation11 + $0x54] ss:$8 sps:$4 sm:$0xff]  }
  0xe0   : > { %v1752_v49 = vld [vmem:[#allocation11 + $0x50] ss:$8 sps:$4 sm:$0xff]   ;;  %v1760_v50 = vld [vmem:[#allocation11 + $0x64] ss:$8 sps:$4 sm:$0xff]   ;;  %v1758_v51 = vld [vmem:[#allocation11 + $0x60] ss:$8 sps:$4 sm:$0xff]  }
  0xe1   : > { %v1721_v1 = vld [vmem:[#allocation9 + $0x4] ss:$8 sps:$4 sm:$0xff]   ;;  %v628_v3 = vld [vmem:[#allocation6] sm:$0xff]  ;;  %v1719_v4 = vld [vmem:[#allocation9] ss:$8 sps:$4 sm:$0xff]  }
  0xe2   : > { %1541 = vmatpush3.bf16.msra.mxu0 %v1710_v15  ;;  %v1727_v5 = vld [vmem:[#allocation9 + $0x14] ss:$8 sps:$4 sm:$0xff]   ;;  %v1725_v6 = vld [vmem:[#allocation9 + $0x10] ss:$8 sps:$4 sm:$0xff]   ;;  %v1733_v7 = vld [vmem:[#allocation9 + $0x24] ss:$8 sps:$4 sm:$0xff]  }
  0xe3   : > { %1542 = vmatprep.subr.bf16.mxu0 %v1711_v16  ;;  %v1731_v8 = vld [vmem:[#allocation9 + $0x20] ss:$8 sps:$4 sm:$0xff]   ;;  %v1739_v9 = vld [vmem:[#allocation9 + $0x34] ss:$8 sps:$4 sm:$0xff]   ;;  %v1737_v10 = vld [vmem:[#allocation9 + $0x30] ss:$8 sps:$4 sm:$0xff]  }
  0xe4   : > { %v1745_v11 = vld [vmem:[#allocation9 + $0x44] ss:$8 sps:$4 sm:$0xff]   ;;  %v1743_v12 = vld [vmem:[#allocation9 + $0x40] ss:$8 sps:$4 sm:$0xff]   ;;  %v1751_v13 = vld [vmem:[#allocation9 + $0x54] ss:$8 sps:$4 sm:$0xff]  }
  0xe5   : > { %v1749_v14 = vld [vmem:[#allocation9 + $0x50] ss:$8 sps:$4 sm:$0xff]   ;;  %v1757_v15 = vld [vmem:[#allocation9 + $0x64] ss:$8 sps:$4 sm:$0xff]   ;;  %v1755_v16 = vld [vmem:[#allocation9 + $0x60] ss:$8 sps:$4 sm:$0xff]  }
  0xe6   : > { %1543 = vmatpush3.bf16.msra.mxu0 %v1712_v17  ;;  %v1763_v17 = vld [vmem:[#allocation9 + $0x74] ss:$8 sps:$4 sm:$0xff]   ;;  %v1761_v19 = vld [vmem:[#allocation9 + $0x70] ss:$8 sps:$4 sm:$0xff]   ;;  %v1769_v21 = vld [vmem:[#allocation12 + $0x4] ss:$8 sps:$4 sm:$0xff]  }
  0xe7   : > { %1544 = vmatprep.subr.bf16.mxu0 %v1713_v20  ;;  %v1766_v18 = vld [vmem:[#allocation11 + $0x74] ss:$8 sps:$4 sm:$0xff]   ;;  %v1764_v20 = vld [vmem:[#allocation11 + $0x70] ss:$8 sps:$4 sm:$0xff]   ;;  %v1767_v27 = vld [vmem:[#allocation12] ss:$8 sps:$4 sm:$0xff]  }
  0xe8   : > { %v1770_v28 = vld [vmem:[#allocation14] ss:$8 sps:$4 sm:$0xff]   ;;  %v1775_v30 = vld [vmem:[#allocation12 + $0x14] ss:$8 sps:$4 sm:$0xff]   ;;  %v1776_v33 = vld [vmem:[#allocation14 + $0x10] ss:$8 sps:$4 sm:$0xff]  }
  0xe9   : > { %v1781_v34 = vld [vmem:[#allocation12 + $0x24] ss:$8 sps:$4 sm:$0xff]   ;;  %v1782_v37 = vld [vmem:[#allocation14 + $0x20] ss:$8 sps:$4 sm:$0xff]  }
  0xea   : > { %1545 = vmatpush3.bf16.msra.mxu0 %v1714_v22  ;;  %v1772_v22 = vld [vmem:[#allocation14 + $0x4] ss:$8 sps:$4 sm:$0xff]  }
  0xeb   : > { %1546 = vmatprep.subr.bf16.mxu0 %v1715_v23  ;;  %v2111_v23 = vmov 0  }
  0xee   : > { %1547 = vmatpush3.bf16.msra.mxu0 %v1716_v24 }
  0xef   : > { %1548 = vmatprep.subr.bf16.mxu0 %v1717_v25 }
  0xf2   : > { %1549 = vmatpush3.bf16.msra.mxu0 %v1718_v26 }
  0xf3   : > { %940 = vmatprep.subr.bf16.mxu0 %v1724_v39  ;;  %v1790_v39 = vld [vmem:[#allocation14 + $0x34] ss:$8 sps:$4 sm:$0xff]  }
  0xf5   : > { %612 = vmatmul.mubr.bf16.vlgmr.msra.gmra.mrb[0].mxu0 %v447_v31  ;;  %v1778_v31 = vld [vmem:[#allocation14 + $0x14] ss:$8 sps:$4 sm:$0xff]  }
  0xf6   : > { %619 = vmatprep.mubr.bf16.mxu0 %v450_v32  ;;  %941 = vmatpush1.bf16.msra.mxu0 %v1722_v38  ;;  %v1773_v32 = vld [vmem:[#allocation12 + $0x10] ss:$8 sps:$4 sm:$0xff]   ;;  %v1787_v38 = vld [vmem:[#allocation12 + $0x34] ss:$8 sps:$4 sm:$0xff]  }
  0xf7   : > { %942 = vmatprep.subr.bf16.mxu0 %v1730_v40  ;;  %v1785_v40 = vld [vmem:[#allocation12 + $0x30] ss:$8 sps:$4 sm:$0xff]  }
  0xfa   : > { %943 = vmatpush1.bf16.msra.mxu0 %v1728_v41  ;;  %v1788_v41 = vld [vmem:[#allocation14 + $0x30] ss:$8 sps:$4 sm:$0xff]  }
  0xfb   : > { %944 = vmatprep.subr.bf16.mxu0 %v1736_v42  ;;  %v1793_v42 = vld [vmem:[#allocation12 + $0x44] ss:$8 sps:$4 sm:$0xff]  }
  0xfd   : > { %620 = vmatmul.mubr.bf16.gmra.mrb[4].mxu0 %v449_v35  ;;  %v1784_v35 = vld [vmem:[#allocation14 + $0x24] ss:$8 sps:$4 sm:$0xff]  }
  0xfe   : > { %945 = vmatpush1.bf16.msra.mxu0 %v1734_v43  ;;  %972 = vmatprep.mubr.bf16.mxu0 %v2111_v23  ;;  %v1796_v43 = vld [vmem:[#allocation14 + $0x44] ss:$8 sps:$4 sm:$0xff]  }
  0xff   : > { %946 = vmatprep.subr.bf16.mxu0 %v1742_v44  ;;  %v1791_v44 = vld [vmem:[#allocation12 + $0x40] ss:$8 sps:$4 sm:$0xff]  }
 0x102   : > { %947 = vmatpush1.bf16.msra.mxu0 %v1740_v45  ;;  %v1794_v45 = vld [vmem:[#allocation14 + $0x40] ss:$8 sps:$4 sm:$0xff]  }
 0x103   : > { %948 = vmatprep.subr.bf16.mxu0 %v1748_v46  ;;  %v1799_v46 = vld [vmem:[#allocation12 + $0x54] ss:$8 sps:$4 sm:$0xff]  }
 0x106   : > { %949 = vmatpush1.bf16.msra.mxu0 %v1746_v47  ;;  %v1802_v47 = vld [vmem:[#allocation14 + $0x54] ss:$8 sps:$4 sm:$0xff]  }
 0x107   : > { %950 = vmatprep.subr.bf16.mxu0 %v1754_v48  ;;  %v1797_v48 = vld [vmem:[#allocation12 + $0x50] ss:$8 sps:$4 sm:$0xff]  }
 0x10a   : > { %951 = vmatpush1.bf16.msra.mxu0 %v1752_v49  ;;  %v1800_v49 = vld [vmem:[#allocation14 + $0x50] ss:$8 sps:$4 sm:$0xff]  }
 0x10b   : > { %952 = vmatprep.subr.bf16.mxu0 %v1760_v50  ;;  %v1805_v50 = vld [vmem:[#allocation12 + $0x64] ss:$8 sps:$4 sm:$0xff]  }
 0x10e   : > { %953 = vmatpush1.bf16.msra.mxu0 %v1758_v51  ;;  %v1808_v51 = vld [vmem:[#allocation14 + $0x64] ss:$8 sps:$4 sm:$0xff]  }
 0x10f   : > { %954 = vmatprep.subr.bf16.mxu0 %v1766_v18 }
 0x112   : > { %955 = vmatpush1.bf16.msra.mxu0 %v1764_v20 }
 0x113   : > { %1218 = vmatprep.subr.bf16.mxu0 %v1772_v22 }
 0x1c8   : > { %v1550_v52 = vpop.f32.mrb[0].mxu0 }
 0x1c9   : > { %v1551_v53 = vpop.f32.mrb[1].mxu0 }
 0x1ca   : > { %v1552_v54 = vadd.f32 %v1551_v53, %v1550_v52  ;;  %v1553_v55 = vpop.f32.mrb[2].mxu0  ;;  %v1803_v52 = vld [vmem:[#allocation12 + $0x60] ss:$8 sps:$4 sm:$0xff]  }
 0x1cb   : > { %v1554_v56 = vpop.f32.mrb[3].mxu0  ;;  %v1806_v53 = vld [vmem:[#allocation14 + $0x60] ss:$8 sps:$4 sm:$0xff]  }
 0x1cc   : > { %v1555_v57 = vadd.f32 %v1554_v56, %v1553_v55  ;;  %v1814_v55 = vld [vmem:[#allocation14 + $0x74] ss:$8 sps:$4 sm:$0xff]   ;;  %v1809_v56 = vld [vmem:[#allocation12 + $0x70] ss:$8 sps:$4 sm:$0xff]  }
 0x1ce   : > { %v1579_v58 = vpack.c.bf16 %v1555_v57, %v1552_v54  ;;  %v1811_v54 = vld [vmem:[#allocation12 + $0x74] ss:$8 sps:$4 sm:$0xff]   ;;  %v1812_v57 = vld [vmem:[#allocation14 + $0x70] ss:$8 sps:$4 sm:$0xff]  }
 0x1d0   : > { %v1556_v59 = vpop.f32.mrb[4].mxu0  ;;  %1580 = vmatpush3.bf16.msra.mxu1 %v1579_v58 }
 0x1d1   : > { %v1557_v60 = vpop.f32.mrb[5].mxu0  ;;  %1581 = vmatprep.subr.bf16.mxu1 %v2108_v36  ;;  %v1779_v36 = vld [vmem:[#allocation12 + $0x20] ss:$8 sps:$4 sm:$0xff]  }
 0x1d2   : > { %v1558_v61 = vadd.f32 %v1557_v60, %v1556_v59  ;;  %v1559_v62 = vpop.f32.mrb[6].mxu0 }
 0x1d3   : > { %v1560_v63 = vpop.f32.mrb[7].mxu0 }
 0x1d4   : > { %v1561_v0 = vadd.f32 %v1560_v63, %v1559_v62 }
 0x1d6   : > { %v1582_v2 = vpack.c.bf16 %v1561_v0, %v1558_v61 }
 0x1d8   : > { %1583 = vmatpush3.bf16.msra.mxu1 %v1582_v2 }
 0x1d9   : > { %801 = vmatprep.subr.bf16.mxu1 %v1721_v1 }
 0x1db   : > { %1576 = vmatmul.mubr.msk.f32.vlgmr.msra.gmra.mrb[0].mxu1 %vm629_vm1, %v628_v3 }
 0x1dc   : > { %802 = vmatpush1.bf16.msra.mxu1 %v1719_v4  ;;  %833 = vmatprep.mubr.bf16.mxu1 %v2111_v23 }
 0x1dd   : > { %803 = vmatprep.subr.bf16.mxu1 %v1727_v5 }
 0x1e0   : > { %804 = vmatpush1.bf16.msra.mxu1 %v1725_v6 }
 0x1e1   : > { %805 = vmatprep.subr.bf16.mxu1 %v1733_v7 }
 0x1e4   : > { %806 = vmatpush1.bf16.msra.mxu1 %v1731_v8 }
 0x1e5   : > { %807 = vmatprep.subr.bf16.mxu1 %v1739_v9 }
 0x1e8   : > { %808 = vmatpush1.bf16.msra.mxu1 %v1737_v10 }
 0x1e9   : > { %809 = vmatprep.subr.bf16.mxu1 %v1745_v11 }
 0x1ec   : > { %810 = vmatpush1.bf16.msra.mxu1 %v1743_v12 }
 0x1ed   : > { %811 = vmatprep.subr.bf16.mxu1 %v1751_v13 }
 0x1f0   : > { %812 = vmatpush1.bf16.msra.mxu1 %v1749_v14 }
 0x1f1   : > { %813 = vmatprep.subr.bf16.mxu1 %v1757_v15 }
 0x1f4   : > { %814 = vmatpush1.bf16.msra.mxu1 %v1755_v16 }
 0x1f5   : > { %815 = vmatprep.subr.bf16.mxu1 %v1763_v17 }
 0x1f8   : > { %816 = vmatpush1.bf16.msra.mxu1 %v1761_v19 }
 0x1f9   : > { %1079 = vmatprep.subr.bf16.mxu1 %v1769_v21 }
 0x2ae   : > { %v699_v24 = vpop.f32.mrb[0].mxu1 }
 0x2af   : > { %v703_v25 = vmax.f32 %v699_v24, 0.0  ;;  %v1577_v26 = vpop.f32.mrb[1].mxu1 }
 0x2b1   : > { %v2471_v29 = vpack.c.bf16 %v703_v25, %v703_v25 }
 0x2b3   : > { %834 = vmatmul.mubr.bf16.vlgmr.msra.gmra.mrb[4].mxu1 %v2471_v29  ;;  %973 = vmatmul.mubr.bf16.vlgmr.msra.gmra.mrb[8].mxu0 %v2471_v29 }
 0x2b4   : > { %1080 = vmatpush1.bf16.msra.mxu1 %v1767_v27  ;;  %1219 = vmatpush1.bf16.msra.mxu0 %v1770_v28 }
 0x2b5   : > { %1081 = vmatprep.subr.bf16.mxu1 %v1775_v30  ;;  %1220 = vmatprep.subr.bf16.mxu0 %v1778_v31 }
 0x2b6   : > { %1111 = vmatprep.mubr.bf16.mxu1 %v2111_v23  ;;  %1250 = vmatprep.mubr.bf16.mxu0 %v2111_v23 }
 0x2b8   : > { %1082 = vmatpush1.bf16.msra.mxu1 %v1773_v32  ;;  %1221 = vmatpush1.bf16.msra.mxu0 %v1776_v33 }
 0x2b9   : > { %1083 = vmatprep.subr.bf16.mxu1 %v1781_v34  ;;  %1222 = vmatprep.subr.bf16.mxu0 %v1784_v35 }
 0x2bc   : > { %1084 = vmatpush1.bf16.msra.mxu1 %v1779_v36  ;;  %1223 = vmatpush1.bf16.msra.mxu0 %v1782_v37 }
 0x2bd   : > { %1085 = vmatprep.subr.bf16.mxu1 %v1787_v38  ;;  %1224 = vmatprep.subr.bf16.mxu0 %v1790_v39 }
 0x2c0   : > { %1086 = vmatpush1.bf16.msra.mxu1 %v1785_v40  ;;  %1225 = vmatpush1.bf16.msra.mxu0 %v1788_v41 }
 0x2c1   : > { %1087 = vmatprep.subr.bf16.mxu1 %v1793_v42  ;;  %1226 = vmatprep.subr.bf16.mxu0 %v1796_v43 }
 0x2c4   : > { %1088 = vmatpush1.bf16.msra.mxu1 %v1791_v44  ;;  %1227 = vmatpush1.bf16.msra.mxu0 %v1794_v45 }
 0x2c5   : > { %1089 = vmatprep.subr.bf16.mxu1 %v1799_v46  ;;  %1228 = vmatprep.subr.bf16.mxu0 %v1802_v47 }
 0x2c8   : > { %1090 = vmatpush1.bf16.msra.mxu1 %v1797_v48  ;;  %1229 = vmatpush1.bf16.msra.mxu0 %v1800_v49 }
 0x2c9   : > { %1091 = vmatprep.subr.bf16.mxu1 %v1805_v50  ;;  %1230 = vmatprep.subr.bf16.mxu0 %v1808_v51 }
 0x2cc   : > { %1092 = vmatpush1.bf16.msra.mxu1 %v1803_v52  ;;  %1231 = vmatpush1.bf16.msra.mxu0 %v1806_v53 }
 0x2cd   : > { %1093 = vmatprep.subr.bf16.mxu1 %v1811_v54  ;;  %1232 = vmatprep.subr.bf16.mxu0 %v1814_v55 }
 0x2d0   : > { %1094 = vmatpush1.bf16.msra.mxu1 %v1809_v56  ;;  %1233 = vmatpush1.bf16.msra.mxu0 %v1812_v57 }
 0x2d3   : > { %1112 = vmatmul.mubr.bf16.vlgmr.msra.gmra.mrb[8].mxu1 %v2471_v29  ;;  %1251 = vmatmul.mubr.bf16.vlgmr.msra.gmra.mrb[12].mxu0 %v2471_v29 }
 0x386   : > { %v835_v58 = vpop.f32.mrb[4].mxu1  ;;  %v974_v59 = vpop.f32.mrb[8].mxu0 }
 0x387   : > { %842 = vst [vmem:[%s2448_s21 + $0x40] sm:$0xff] %v835_v58  ;;  %981 = vst [vmem:[%s2448_s21 + $0x50] sm:$0xff] %v974_v59  ;;  %v837_v60 = vpop.f32.mrb[5].mxu1  ;;  %v976_v61 = vpop.f32.mrb[9].mxu0 }
 0x388   : > { %843 = vst [vmem:[%s2448_s21 + $0x48] sm:$0xff] %v837_v60  ;;  %982 = vst [vmem:[%s2448_s21 + $0x58] sm:$0xff] %v976_v61  ;;  %v839_v62 = vpop.f32.mrb[6].mxu1  ;;  %v978_v63 = vpop.f32.mrb[10].mxu0 }
 0x389   : > { %v840_v0 = vpop.f32.mrb[7].mxu1  ;;  %v979_v1 = vpop.f32.mrb[11].mxu0 }
 0x3a6   : > { %v1113_v2 = vpop.f32.mrb[8].mxu1  ;;  %v1252_v3 = vpop.f32.mrb[12].mxu0 }
 0x3a7   : > { %1120 = vst [vmem:[%s2448_s21 + $0x60] sm:$0xff] %v1113_v2  ;;  %1259 = vst [vmem:[%s2448_s21 + $0x70] sm:$0xff] %v1252_v3  ;;  %v1115_v4 = vpop.f32.mrb[9].mxu1  ;;  %v1254_v5 = vpop.f32.mrb[13].mxu0 }
 0x3a8   : > { %1121 = vst [vmem:[%s2448_s21 + $0x68] sm:$0xff] %v1115_v4  ;;  %1260 = vst [vmem:[%s2448_s21 + $0x78] sm:$0xff] %v1254_v5  ;;  %v1117_v6 = vpop.f32.mrb[10].mxu1  ;;  %v1256_v7 = vpop.f32.mrb[14].mxu0 }
 0x3a9   : > { %v1118_v8 = vpop.f32.mrb[11].mxu1  ;;  %v1257_v9 = vpop.f32.mrb[15].mxu0 }
 0x3aa   : > { %2073 = dma.done.wait [#allocation2], 1024 }
 0x3ab   : > { %2074 = vsyncadd [#allocation2], 4294966272  ;;  %s1533_s9 = sshll.u32 %s2176_s30, 11  ;;  %s1280_s16 = sshll.u32 %s2448_s21, 4  ;;  %s2492_s16 = int_to_ptr.vmem [resolvable:$true] %s1280_s16 }
 0x3ac   : > { %s2489_s18 = scalar_lea.hbm %s2543_s7, %s1533_s9  ;;  %s1267_s17 = scalar_lea.sflag [#allocation5], %s2422_s13 }
 0x3ad   : > { %s2013_s22 = scalar_lea.vmem %s2492_s16, 2048  ;;  %p2566_p12 = scmp.ne.s32.totalorder %s2556_s20, 0 }
 0x3ae   : > { %p2014_p6 = scmp.ne.s32.totalorder %s2492_s16, %s2013_s22  ;;  %s2112_s12 = smov [#allocation15]  }
 0x3af   : > { %s2017_s29 = sshll.u32 %s2112_s12, 4  ;;  %s2018_s29 = int_to_ptr.vmem [resolvable:$false] %s2017_s29 }
 0x3b0   : > { %p2015_p5 = pnand %p2014_p6, %p2566_p12  ;;  %s2019_s30 = scalar_lea.vmem %s2018_s29, 4096 }
 0x3b1   : > { %p2020_p4 = scmp.lt.s32.totalorder %s2492_s16, %s2018_s29  ;;  %p2021_p1 = scmp.lt.s32.totalorder %s2019_s30, %s2013_s22 }
 0x3b2   : > { %p2016_p7 = pneg %p2015_p5 }
 0x3b3   : > { %p2022_p3 = por %p2021_p1, %p2020_p4 }
 0x3b5   : > { %p2023_p8 = pnand %p2022_p3, %p2016_p7 }
 0x3b7   : > { %2026 = shalt.err (!%p2023_p8)
}
 0x3b8   : > { %s2027_s14 = scalar_lea.hbm %s2489_s18, 2048  ;;  %s2031_s21 = scalar_lea.hbm %s2543_s7, 4096 }
 0x3b9   : > { %p2028_p13 = scmp.ne.s32.totalorder %s2489_s18, %s2027_s14  ;;  %p2032_p9 = scmp.lt.u32.totalorder %s2489_s18, %s2543_s7 }
 0x3ba   : > { %p2033_p10 = scmp.lt.u32.totalorder %s2031_s21, %s2027_s14  ;;  %p2035_p6 = scmp.lt.u32.totalorder %s2027_s14, %s2489_s18 }
 0x3bb   : > { %p2029_p0 = pnand %p2028_p13, %p2566_p12 }
 0x3bc   : > { %p2034_p11 = por %p2033_p10, %p2032_p9 }
 0x3bd   : > { %p2030_p2 = pneg %p2029_p0 }
 0x3be   : > { %p2036_p5 = por %p2035_p6, %p2034_p11 }
 0x3c0   : > { %p2037_p7 = pnand %p2036_p5, %p2030_p2 }
 0x3c2   : > { %2040 = shalt.err (!%p2037_p7)
}
 0x3c3   : > { %s2113_s11 = smov 256   ;;  %s2114_s22 = smov 16  }
 0x3c4   : > { %1610 = dma.vmem_to_hbm [thread:$0]  (%p2566_p12), %s2492_s16, 2048, %s2489_s18, %s1267_s17, %s2113_s11, %s2113_s11, %s2114_s22  }
 0x3c5 PF: > { %s1295_s12 = sand.u32 1, %s2081_s24   ;;  %p2567_p4 = scmp.ne.s32.totalorder %s2557_s15, 0 }
 0x3c6   : > { %p2568_p1 = scmp.ge.s32.totalorder %s2093_s27, 2  ;;  %s1296_s29 = scalar_lea.sflag [#allocation5], %s1295_s12 }
 0x3c8   : > { %p1636_p3 = pnand %p2568_p1, %p2567_p4 }
 0x3ca   : > { %2076 = dma.done.wait (!%p1636_p3), %s1296_s29, 2048  }
 0x3cb   : > { %2078 = vsyncadd (!%p1636_p3), %s1296_s29, 4294965248  ;;  %p23_p8 = scmp.ge.s32.totalorder %s2343_s19, 4   ;;  %s2569_s24 = smov %s2085_s25 }
 0x3cc   : > { %s2570_s25 = smov %s2089_s26  ;;  %s2571_s26 = smov %s2354_s28 }
 0x3cd   : > { %s2572_s27 = smov %s2343_s19  ;;  %25 = sbr.rel (!%p23_p8) target bundleno = 8 (0x8), region = 159 }
 0x3d4   :  { %1301 = vsyncpa [#allocation4], 1 }
 0x3d5   :  { %1303 = vsyncpa [#allocation4 + $0x1], 1 }
 0x3d6   :  { %1304 = vsyncpa [#allocation7], 1 }
 0x3d7   :  { %1305 = vsyncpa [#allocation10], 1 }
 0x3d8   :  { %1306 = vsyncpa [#allocation13], 1 }
 0x3d9   :  { %1307 = vsyncpa [#allocation5], 1 }
 0x3da   :  { %1309 = vsyncpa [#allocation5 + $0x1], 1 }
 0x3db   :  { %1310 = vsyncmov [#allocation2] }
 0x3de   :  { %s1311_s27 = vpop.sfrf %1310 }
 0x3df   :  { %p1531_p12 = scmp.ne.s32.totalorder %s1311_s27, 0 }
 0x3e1   :  { %1315 = shalt.err (%p1531_p12)  }

</bundles_post_ra>
